<compile_context>
chip_gen: v6e
topology: v6e:2x2x1
jax: 0.10.0
libtpu: 0.0.40
codegen_flags: <defaults>
</compile_context>

<pallas_src>
import math

import jax
import jax.numpy as jnp
from jax.experimental import pallas as pl
from jax.experimental.pallas import tpu as pltpu


def _round_up(a, b):
    return ((a + b - 1) // b) * b


def _complex_mul_kernel(x_ref, w_same_ref, w_plus_ref, w_minus_ref, o_ref):
    """Complex multiply on an interleaved (rows, L) tile.

    Lane 2k holds real_k, lane 2k+1 holds imag_k.  With
        w_same  = [ wr0, wr0,  wr1, wr1, ...]
        w_plus  = [   0, wi0,    0, wi1, ...]   (pairs with roll(+1): real -> odd lanes)
        w_minus = [-wi0,   0, -wi1,   0, ...]   (pairs with roll(-1): imag -> even lanes)
    the result per pair is
        even lane: re*wr - im*wi     odd lane: im*wr + re*wi
    Wrapped lanes from the rolls always multiply a zero weight.
    """
    x = x_ref[...].astype(jnp.float32)                # single upcast (bf16-safe)
    tr, lanes = x.shape
    x_prev = pltpu.roll(x, shift=1, axis=1)           # x_prev[:, i] = x[:, i-1]
    x_next = pltpu.roll(x, shift=lanes - 1, axis=1)   # x_next[:, i] = x[:, i+1]
    # Weights live as (8, L) VMEM blocks. Viewing the (tr, L) tile as
    # (tr//8, 8, L) (tile-aligned split of the sublane dim -> free) turns the
    # weight broadcast into a leading-dim broadcast: plain per-vreg vmuls.
    x3 = x.reshape(tr // 8, 8, lanes)
    xp3 = x_prev.reshape(tr // 8, 8, lanes)
    xn3 = x_next.reshape(tr // 8, 8, lanes)
    out = (x3 * w_same_ref[...]
           + xp3 * w_plus_ref[...]
           + xn3 * w_minus_ref[...])
    o_ref[...] = out.reshape(tr, lanes).astype(o_ref.dtype)


def _choose_lane_width(total, two_f, max_lanes):
    # Always a multiple of both 2F (weight tiling) and 128 (unmasked vst).
    lane_width = (two_f * 128) // math.gcd(two_f, 128)
    # Grow only when it costs no padding (keeps the zero-fill tiny).
    while lane_width * 2 <= max_lanes and total % (lane_width * 2) == 0:
        lane_width *= 2
    return lane_width


def _choose_tile_rows(rows, lane_width, itemsize, block_budget_bytes, min_grid):
    bytes_per_row = lane_width * itemsize
    # Largest multiple of 8 that fits the per-block VMEM budget.
    tr_budget = max(8, (block_budget_bytes // max(bytes_per_row, 1)) // 8 * 8)
    # Aim for >= min_grid tiles so megacore sharding / pipelining kick in.
    tr_grid = _round_up(max(1, pl.cdiv(rows, min_grid)), 8)
    tr = max(8, min(tr_budget, tr_grid))
    # Prefer an exact divisor of rows (no pad / no partial tile), but don't
    # shrink the block by more than 2x for it.
    if rows % 8 == 0:
        for cand in range(tr, max(8, tr // 2) - 1, -8):
            if rows % cand == 0:
                return cand
    return tr


def complex_mul_layer(x, real_weights, imag_weights, *,
                      block_budget_bytes=2 * 1024 * 1024,
                      max_lanes=1024, min_grid=4):
    """Per-feature complex multiply (DFFN's `x_patch_fft * self.fft`).

    x: [..., num_features, 2] with last dim = (real, imag), feature axis
       adjacent to the complex axis (row-major contiguous).
    real_weights / imag_weights: [num_features].
    Returns an array with the same shape/dtype as x.
    """
    orig_shape = x.shape
    assert orig_shape[-1] == 2, "last dim must be (real, imag)"
    num_features = orig_shape[-2]
    assert real_weights.shape == (num_features,)
    assert imag_weights.shape == (num_features,)

    two_f = 2 * num_features
    total = 1
    for d in orig_shape:
        total *= int(d)

    # --- lane-dense fold: (rows, lane_width), lane_width % 128 == 0 always ---
    lane_width = _choose_lane_width(total, two_f, max_lanes)
    reps = lane_width // two_f

    itemsize = jnp.dtype(x.dtype).itemsize
    rows_raw = pl.cdiv(total, lane_width)
    tr = _choose_tile_rows(rows_raw, lane_width, itemsize,
                           block_budget_bytes, min_grid)
    rows = _round_up(rows_raw, tr)        # no partial last tile

    # --- pre-interleaved weight vectors, broadcast to 8 sublanes (tiny) ---
    wr = real_weights.astype(jnp.float32)
    wi = imag_weights.astype(jnp.float32)
    zeros = jnp.zeros_like(wi)
    w_same = jnp.repeat(wr, 2)                               # [wr0,wr0,wr1,wr1,...]
    w_plus = jnp.stack((zeros, wi), axis=-1).reshape(-1)     # [0,wi0,0,wi1,...]
    w_minus = jnp.stack((-wi, zeros), axis=-1).reshape(-1)   # [-wi0,0,-wi1,0,...]

    def _prep(w):
        return jnp.broadcast_to(jnp.tile(w, reps)[None, :], (8, lane_width))

    w_same, w_plus, w_minus = _prep(w_same), _prep(w_plus), _prep(w_minus)

    # Free contiguous reshape; zero-pad only when the fold is not exact.
    x1d = x.reshape(-1)
    pad = rows * lane_width - total
    if pad:
        x1d = jnp.pad(x1d, (0, pad))
    x_flat = x1d.reshape(rows, lane_width)

    grid = (rows // tr,)
    out_flat = pl.pallas_call(
        _complex_mul_kernel,
        out_shape=jax.ShapeDtypeStruct((rows, lane_width), x.dtype),
        grid=grid,
        in_specs=[
            pl.BlockSpec((tr, lane_width), lambda i: (i, 0)),
            pl.BlockSpec((8, lane_width), lambda i: (0, 0)),   # weights: DMA'd once
            pl.BlockSpec((8, lane_width), lambda i: (0, 0)),
            pl.BlockSpec((8, lane_width), lambda i: (0, 0)),
        ],
        out_specs=pl.BlockSpec((tr, lane_width), lambda i: (i, 0)),
        compiler_params=pltpu.CompilerParams(
            dimension_semantics=("parallel",),   # shard row tiles across v7x's 2 TCs
            vmem_limit_bytes=32 * 1024 * 1024,
        ),
    )(x_flat, w_same, w_plus, w_minus)

    out1d = out_flat.reshape(-1)
    if pad:
        out1d = out1d[:total]
    return out1d.reshape(orig_shape)


def _reference(x, wr, wi):
    rp, ip = x[..., 0], x[..., 1]
    out_r = rp * wr - ip * wi
    out_i = rp * wi + ip * wr
    return jnp.stack((out_r, out_i), axis=-1)


if __name__ == "__main__":
    key = jax.random.PRNGKey(0)
    k1, k2, k3, k4 = jax.random.split(key, 4)

    # Case 1: module-faithful init (self.fft = ones -> real weight 1, imag 0).
    batch, channels, num_features = 2, 4, 16
    x = jax.random.normal(k1, (batch, channels, num_features, 2), dtype=jnp.float32)
    wr = jnp.ones((num_features,), dtype=jnp.float32)
    wi = jnp.zeros((num_features,), dtype=jnp.float32)
    out = jax.block_until_ready(complex_mul_layer(x, wr, wi))
    ref = _reference(x, wr, wi)
    assert out.shape == x.shape
    assert jnp.allclose(out, ref, atol=1e-6, rtol=1e-6), "case 1 mismatch"

    # Case 2: random complex weights (exercises the roll-based imaginary path).
    x2 = jax.random.normal(k2, (batch, channels, num_features, 2), dtype=jnp.float32)
    wr2 = jax.random.normal(k3, (num_features,), dtype=jnp.float32)
    wi2 = jax.random.normal(k4, (num_features,), dtype=jnp.float32)
    out2 = jax.block_until_ready(complex_mul_layer(x2, wr2, wi2))
    ref2 = _reference(x2, wr2, wi2)
    assert jnp.allclose(out2, ref2, atol=1e-5, rtol=1e-5), "case 2 mismatch"

    # Case 3: larger shape -> multi-step grid (pipelined, megacore-parallel).
    x3 = jax.random.normal(k2, (8, 64, 64, 2), dtype=jnp.float32)
    wr3 = jax.random.normal(k3, (64,), dtype=jnp.float32)
    wi3 = jax.random.normal(k4, (64,), dtype=jnp.float32)
    out3 = jax.block_until_ready(complex_mul_layer(x3, wr3, wi3))
    ref3 = _reference(x3, wr3, wi3)
    assert jnp.allclose(out3, ref3, atol=1e-5, rtol=1e-5), "case 3 mismatch"

    # Case 4: awkward sizes -> exercises the zero-pad path (no masked stores).
    x4 = jax.random.normal(k1, (3, 5, 24, 2), dtype=jnp.float32)
    wr4 = jax.random.normal(k3, (24,), dtype=jnp.float32)
    wi4 = jax.random.normal(k4, (24,), dtype=jnp.float32)
    out4 = jax.block_until_ready(complex_mul_layer(x4, wr4, wi4))
    ref4 = _reference(x4, wr4, wi4)
    assert out4.shape == x4.shape
    assert jnp.allclose(out4, ref4, atol=1e-5, rtol=1e-5), "case 4 mismatch"

    print("KERNEL_OK")
</pallas_src>

<mosaic_0001>
module attributes {stable_mosaic.version = 11 : i64} {
  func.func @_complex_mul_kernel(%arg0: i32, %arg1: memref<8x256xf32, #tpu.memory_space<vmem>>, %arg2: memref<8x256xf32, #tpu.memory_space<vmem>>, %arg3: memref<8x256xf32, #tpu.memory_space<vmem>>, %arg4: memref<8x256xf32, #tpu.memory_space<vmem>>, %arg5: memref<8x256xf32, #tpu.memory_space<vmem>>) attributes {dimension_semantics = [#tpu.dimension_semantics<parallel>], iteration_bounds = array<i64: 1>, scalar_prefetch = 0 : i64, scratch_operands = 0 : i64, tpu.core_type = #tpu.core_type<tc>, window_params = [{transform_indices = @transform_0, window_bounds = array<i64: 8, 256>}, {pipeline_mode = #tpu.pipeline_mode<synchronous>, transform_indices = @transform_1, window_bounds = array<i64: 8, 256>}, {pipeline_mode = #tpu.pipeline_mode<synchronous>, transform_indices = @transform_2, window_bounds = array<i64: 8, 256>}, {pipeline_mode = #tpu.pipeline_mode<synchronous>, transform_indices = @transform_3, window_bounds = array<i64: 8, 256>}, {transform_indices = @transform_4, window_bounds = array<i64: 8, 256>}]} {
    %c0 = arith.constant 0 : index
    %c0_0 = arith.constant 0 : index
    %0 = vector.load %arg1[%c0, %c0_0] : memref<8x256xf32, #tpu.memory_space<vmem>>, vector<8x256xf32>
    %c1_i32 = arith.constant 1 : i32
    %1 = tpu.dynamic_rotate %0 by %c1_i32 dim 1 : vector<8x256xf32>, i32 -> vector<8x256xf32>
    %c255_i32 = arith.constant 255 : i32
    %2 = tpu.dynamic_rotate %0 by %c255_i32 dim 1 : vector<8x256xf32>, i32 -> vector<8x256xf32>
    %3 = vector.shape_cast %0 : vector<8x256xf32> to vector<1x8x256xf32>
    %4 = vector.shape_cast %1 : vector<8x256xf32> to vector<1x8x256xf32>
    %5 = vector.shape_cast %2 : vector<8x256xf32> to vector<1x8x256xf32>
    %c0_1 = arith.constant 0 : index
    %c0_2 = arith.constant 0 : index
    %6 = vector.load %arg2[%c0_1, %c0_2] : memref<8x256xf32, #tpu.memory_space<vmem>>, vector<8x256xf32>
    %7 = vector.shape_cast %6 : vector<8x256xf32> to vector<1x8x256xf32>
    %8 = arith.mulf %3, %7 : vector<1x8x256xf32>
    %c0_3 = arith.constant 0 : index
    %c0_4 = arith.constant 0 : index
    %9 = vector.load %arg3[%c0_3, %c0_4] : memref<8x256xf32, #tpu.memory_space<vmem>>, vector<8x256xf32>
    %10 = vector.shape_cast %9 : vector<8x256xf32> to vector<1x8x256xf32>
    %11 = arith.mulf %4, %10 : vector<1x8x256xf32>
    %12 = arith.addf %8, %11 : vector<1x8x256xf32>
    %c0_5 = arith.constant 0 : index
    %c0_6 = arith.constant 0 : index
    %13 = vector.load %arg4[%c0_5, %c0_6] : memref<8x256xf32, #tpu.memory_space<vmem>>, vector<8x256xf32>
    %14 = vector.shape_cast %13 : vector<8x256xf32> to vector<1x8x256xf32>
    %15 = arith.mulf %5, %14 : vector<1x8x256xf32>
    %16 = arith.addf %12, %15 : vector<1x8x256xf32>
    %17 = vector.shape_cast %16 : vector<1x8x256xf32> to vector<8x256xf32>
    %c0_7 = arith.constant 0 : index
    %c0_8 = arith.constant 0 : index
    %18 = vector.load %arg5[%c0_7, %c0_8] : memref<8x256xf32, #tpu.memory_space<vmem>>, vector<8x256xf32>
    tpu.vector_store %arg5[%c0_7, %c0_8], %17 {strides = array<i32>} : memref<8x256xf32, #tpu.memory_space<vmem>>, vector<8x256xf32>,
    return
  }
  func.func @transform_0(%arg0: i32) -> (i32, i32) {
    %c0_i32 = arith.constant 0 : i32
    %c0_i32_0 = arith.constant 0 : i32
    return %arg0, %c0_i32 : i32, i32
  }
  func.func @transform_1(%arg0: i32) -> (i32, i32) {
    %c0_i32 = arith.constant 0 : i32
    %c0_i32_0 = arith.constant 0 : i32
    %c0_i32_1 = arith.constant 0 : i32
    return %c0_i32, %c0_i32_0 : i32, i32
  }
  func.func @transform_2(%arg0: i32) -> (i32, i32) {
    %c0_i32 = arith.constant 0 : i32
    %c0_i32_0 = arith.constant 0 : i32
    %c0_i32_1 = arith.constant 0 : i32
    return %c0_i32, %c0_i32_0 : i32, i32
  }
  func.func @transform_3(%arg0: i32) -> (i32, i32) {
    %c0_i32 = arith.constant 0 : i32
    %c0_i32_0 = arith.constant 0 : i32
    %c0_i32_1 = arith.constant 0 : i32
    return %c0_i32, %c0_i32_0 : i32, i32
  }
  func.func @transform_4(%arg0: i32) -> (i32, i32) {
    %c0_i32 = arith.constant 0 : i32
    %c0_i32_0 = arith.constant 0 : i32
    return %arg0, %c0_i32 : i32, i32
  }
}

</mosaic_0001>

<bundles_post_ra>
// kernel: tpu_custom_call.1
= control target key start
LH: loop header
LB: loop body
LE: loop exit
PB: predicated region body
PF: predicated region fallthrough
CT: control target
= control target key end

     0   :  { %9 = vsyncpa [#allocation3], 0  ;;  %s280_s0 = inlined_call_operand.hbm [shape: f32[8,256], index: 0, kind: input, shape index: {}]   ;;  %s281_s1 = inlined_call_operand.hbm [shape: f32[8,256], index: 1, kind: input, shape index: {}]   ;;  %s282_s2 = inlined_call_operand.hbm [shape: f32[8,256], index: 2, kind: input, shape index: {}]   ;;  %s283_s3 = inlined_call_operand.hbm [shape: f32[8,256], index: 3, kind: input, shape index: {}]   ;;  %s284_s4 = inlined_call_operand.hbm [shape: f32[8,256], index: 4, kind: output, shape index: {}]  }
   0x1   :  { %10 = vsyncpa [#allocation6], 0 }
   0x2   :  { %11 = vsyncpa [#allocation9], 0 }
   0x3   :  { %12 = vsyncpa [#allocation4], 0  ;;  %s233_s15 = smov [#allocation5]   ;;  %s234_s17 = smov [#allocation2]  }
   0x4   :  { %s29_s16 = sshll.u32 %s233_s15, 4  ;;  %s19_s18 = sshll.u32 %s234_s17, 4  ;;  %s30_s16 = int_to_ptr.vmem [resolvable:$true] %s29_s16  ;;  %s20_s18 = int_to_ptr.vmem [resolvable:$true] %s19_s18 }
   0x5   :  { %s133_s19 = scalar_lea.vmem %s30_s16, 256  ;;  %p138_p1 = scmp.lt.s32.totalorder %s30_s16, %s30_s16 }
   0x6   :  { %p134_p0 = scmp.ne.s32.totalorder %s30_s16, %s133_s19  ;;  %p139_p2 = scmp.lt.s32.totalorder %s133_s19, %s133_s19 }
   0x8   :  { %p140_p3 = por %p139_p2, %p138_p1 }
   0xa   :  { %p141_p4 = pnand %p140_p3, %p134_p0 }
   0xc   :  { %144 = shalt.err (!%p141_p4)
}
   0xd   :  { %32 = dma.hbm_to_vmem [thread:$0]  %s281_s1, 256, %s30_s16, [#allocation6]  }
   0xe   :  { %s153_s22 = scalar_lea.vmem %s20_s18, 256  ;;  %p158_p6 = scmp.lt.s32.totalorder %s20_s18, %s20_s18 }
   0xf   :  { %p154_p5 = scmp.ne.s32.totalorder %s20_s18, %s153_s22  ;;  %p159_p7 = scmp.lt.s32.totalorder %s153_s22, %s153_s22 }
  0x11   :  { %p160_p8 = por %p159_p7, %p158_p6 }
  0x13   :  { %p161_p9 = pnand %p160_p8, %p154_p5 }
  0x15   :  { %164 = shalt.err (!%p161_p9)
}
  0x16   :  { %22 = dma.hbm_to_vmem [thread:$0]  %s280_s0, 256, %s20_s18, [#allocation3]  }
  0x17   :  { %s235_s25 = smov [#allocation7]   ;;  %s236_s27 = smov [#allocation8]  }
  0x18   :  { %s39_s26 = sshll.u32 %s235_s25, 4  ;;  %s49_s28 = sshll.u32 %s236_s27, 4  ;;  %s40_s26 = int_to_ptr.vmem [resolvable:$true] %s39_s26  ;;  %s50_s28 = int_to_ptr.vmem [resolvable:$true] %s49_s28 }
  0x19   :  { %s173_s29 = scalar_lea.vmem %s40_s26, 256  ;;  %p178_p11 = scmp.lt.s32.totalorder %s40_s26, %s40_s26 }
  0x1a   :  { %p174_p10 = scmp.ne.s32.totalorder %s40_s26, %s173_s29  ;;  %p179_p12 = scmp.lt.s32.totalorder %s173_s29, %s173_s29 }
  0x1c   :  { %p180_p13 = por %p179_p12, %p178_p11 }
  0x1e   :  { %p181_p0 = pnand %p180_p13, %p174_p10 }
  0x20   :  { %184 = shalt.err (!%p181_p0)
}
  0x21   :  { %42 = dma.hbm_to_vmem [thread:$0]  %s282_s2, 256, %s40_s26, [#allocation6]  }
  0x22   :  { %s193_s5 = scalar_lea.vmem %s50_s28, 256  ;;  %p198_p2 = scmp.lt.s32.totalorder %s50_s28, %s50_s28 }
  0x23   :  { %p194_p1 = scmp.ne.s32.totalorder %s50_s28, %s193_s5  ;;  %p199_p3 = scmp.lt.s32.totalorder %s193_s5, %s193_s5 }
  0x25   :  { %p200_p4 = por %p199_p3, %p198_p2 }
  0x27   :  { %p201_p5 = pnand %p200_p4, %p194_p1 }
  0x29   :  { %204 = shalt.err (!%p201_p5)
}
  0x2a   :  { %52 = dma.hbm_to_vmem [thread:$0]  %s283_s3, 256, %s50_s28, [#allocation9]  }
  0x2b   :  { %225 = dma.done.wait [#allocation3], 256  }
  0x2c   :  { %226 = vsyncadd [#allocation3], 4294967040 }
  0x2d   :  { %227 = dma.done.wait [#allocation6], 512  }
  0x2e   :  { %228 = vsyncadd [#allocation6], 4294966784 }
  0x2f   :  { %229 = dma.done.wait [#allocation9], 256  }
  0x30   :  { %230 = vsyncadd [#allocation9], 4294967040  ;;  %v65_v0 = vld [vmem:[#allocation2] sm:$0xff]  ;;  %s237_s7 = smov 127   ;;  %s238_s2 = smov 1   ;;  %v66_v1 = vld [vmem:[#allocation2 + $0x8] sm:$0xff]  ;;  %v71_v2 = vlaneseq }
  0x31   :  { %76 = vrot.lane.b32.xlu1 %v65_v0, %s237_s7  ;;  %67 = vrot.lane.b32.xlu0 %v65_v0, %s238_s2  ;;  %v83_v6 = vld [vmem:[#allocation5] sm:$0xff]  ;;  %v84_v7 = vld [vmem:[#allocation5 + $0x8] sm:$0xff]  ;;  %v87_v8 = vld [vmem:[#allocation7] sm:$0xff]  ;;  %s239_s3 = smov [#allocation10]  }
  0x32   :  { %v72_v3 = vand.u32 127, %v71_v2  ;;  %v88_v9 = vld [vmem:[#allocation7 + $0x8] sm:$0xff]  ;;  %v85_v10 = vmul.f32 %v83_v6, %v65_v0  ;;  %v86_v11 = vmul.f32 %v84_v7, %v66_v1  ;;  %v93_v14 = vld [vmem:[#allocation8] sm:$0xff]  ;;  %v94_v15 = vld [vmem:[#allocation8 + $0x8] sm:$0xff]  ;;  %s107_s8 = sshll.u32 %s239_s3, 4  ;;  %s108_s8 = int_to_ptr.vmem [resolvable:$true] %s107_s8 }
  0x33   :  { %s205_s9 = scalar_lea.vmem %s108_s8, 256  ;;  %p210_p7 = scmp.lt.s32.totalorder %s108_s8, %s108_s8 }
  0x34   :  { %vm80_vm0 = vcmp.lt.s32.totalorder %v72_v3, 127  ;;  %vm73_vm1 = vcmp.lt.s32.totalorder %v72_v3, 1  ;;  %p206_p6 = scmp.ne.s32.totalorder %s108_s8, %s205_s9  ;;  %p211_p8 = scmp.lt.s32.totalorder %s205_s9, %s205_s9 }
  0x35   :  { %78 = vrot.lane.b32.xlu1 %v66_v1, %s237_s7  ;;  %69 = vrot.lane.b32.xlu0 %v66_v1, %s238_s2 }
  0x36   :  { %p212_p9 = por %p211_p8, %p210_p7 }
  0x38   :  { %p213_p10 = pnand %p212_p9, %p206_p6 }
  0xa3   :  { %v77_v4 = vpop.permute.xlu1 %76  ;;  %v68_v5 = vpop.permute.xlu0 %67 }
  0xa7   :  { %v79_v12 = vpop.permute.xlu1 %78  ;;  %v70_v13 = vpop.permute.xlu0 %69 }
  0xa8   :  { %v81_v16 = vsel %vm80_vm0, %v77_v4, %v79_v12  ;;  %v82_v17 = vsel %vm80_vm0, %v79_v12, %v77_v4  ;;  %v74_v18 = vsel %vm73_vm1, %v68_v5, %v70_v13  ;;  %v75_v19 = vsel %vm73_vm1, %v70_v13, %v68_v5 }
  0xa9   :  { %v89_v20 = vmul.f32 %v87_v8, %v75_v19  ;;  %v90_v21 = vmul.f32 %v88_v9, %v74_v18  ;;  %v95_v22 = vmul.f32 %v93_v14, %v81_v16  ;;  %v96_v23 = vmul.f32 %v94_v15, %v82_v17 }
  0xab   :  { %v91_v24 = vadd.f32 %v89_v20, %v85_v10  ;;  %v92_v25 = vadd.f32 %v90_v21, %v86_v11 }
  0xad   :  { %v97_v26 = vadd.f32 %v95_v22, %v91_v24  ;;  %v98_v27 = vadd.f32 %v96_v23, %v92_v25 }
  0xaf   :  { %99 = vst [vmem:[#allocation10] sm:$0xff] %v97_v26  ;;  %100 = vst [vmem:[#allocation10 + $0x8] sm:$0xff] %v98_v27 }
  0xb0   :  { %216 = shalt.err (!%p213_p10)
}
  0xb1   :  { %110 = dma.vmem_to_hbm [thread:$0]  %s108_s8, 256, %s284_s4, [#allocation4]  }
  0xb2   :  { %231 = dma.done.wait [#allocation4], 256  }
  0xb3   :  { %232 = vsyncadd [#allocation4], 4294967040 }
  0xb4   :  { %114 = vsyncpa [#allocation3], 1 }
  0xb5   :  { %115 = vsyncpa [#allocation6], 1 }
  0xb6   :  { %116 = vsyncpa [#allocation9], 1 }
  0xb7   :  { %117 = vsyncpa [#allocation4], 1 }

</bundles_post_ra>
